<compile_context>
chip_gen: v5e
topology: v5e:2x2
jax: 0.10.0
libtpu: 0.0.40
codegen_flags: <defaults>
</compile_context>

<pallas_src>
import functools

import jax
import jax.numpy as jnp
from jax.experimental import pallas as pl
from jax.experimental.pallas import tpu as pltpu


def _round_up(x, m):
    return ((x + m - 1) // m) * m


def _choose_tile_b(N, tile_b):
    """Hardware-friendly batch tile: multiple of 8, >= 2 grid steps when possible."""
    tile_b = max(8, _round_up(int(tile_b), 8))
    if N >= 16:
        # Keep at least 2 grid steps so dimension_semantics=("parallel",) can shard
        # the batch across both TensorCores on v7x.
        tile_b = min(tile_b, _round_up(-(-N // 2), 8))
    else:
        tile_b = min(tile_b, _round_up(N, 8))
    return tile_b


def _snet_kernel(x_ref,
                 w1_ref, b1_ref,
                 w2_ref, b2_ref,
                 w3_ref, b3_ref,
                 w4_ref, b4_ref,
                 w5_ref, b5_ref,
                 w6_ref, b6_ref,
                 o_ref,
                 *, act_fn, bf16_act):
    if act_fn == "tanh":
        act = jnp.tanh
    elif act_fn == "relu":
        act = lambda v: jnp.maximum(v, 0.0)
    elif act_fn == "sigmoid":
        act = jax.nn.sigmoid
    else:
        # TODO(synk): 'rrelu' is stochastic in training mode; not implemented here.
        raise ValueError(f"unsupported act_fn {act_fn}")

    def layer(y16, w_ref, b_ref, last=False):
        # bf16 MXU operands, f32 accumulation + f32 bias add.
        z = jnp.dot(y16, w_ref[...], preferred_element_type=jnp.float32) + b_ref[...]
        if last:
            return z
        if bf16_act:
            # v6e/v7x: bf16 EUP -> ~2x transcendental throughput, halves temporaries.
            return act(z.astype(jnp.bfloat16))
        # v5e-safe path: activation in f32, single cast to the next MXU operand.
        return act(z).astype(jnp.bfloat16)

    # x is already bf16 (cast once in the wrapper).
    y = x_ref[...]
    y = layer(y, w1_ref, b1_ref)
    y = layer(y, w2_ref, b2_ref)
    y = layer(y, w3_ref, b3_ref)
    y = layer(y, w4_ref, b4_ref)
    y = layer(y, w5_ref, b5_ref)
    y = layer(y, w6_ref, b6_ref, last=True)

    o_ref[...] = y.astype(o_ref.dtype)


def snet_forward(x, params, *, act_fn="tanh", tile_b=2048, bf16_act=False):
    """x: (N, D_in) f32; params: list of (W (in,out), b (1,out)) for 6 layers (f32)."""
    N, D_in = x.shape
    D_out = params[-1][0].shape[1]

    tile_b = _choose_tile_b(N, tile_b)
    grid = (pl.cdiv(N, tile_b),)  # boundary block (if any) is masked by Pallas

    # Cast the streamed input once, outside the grid: 8 B/row DMA instead of 16.
    x16 = x.astype(jnp.bfloat16)

    # Prepare weights once per call: bf16 MXU operands, f32 biases.  The last layer
    # stays unpadded (D_out=2): the MXU handles a narrow N dim and the output
    # writeback is 64x smaller than a 128-lane f32 pad.
    flat_args = []
    in_specs = [pl.BlockSpec((tile_b, D_in), lambda i: (i, 0))]
    for (w, b) in params:
        w = jnp.asarray(w, jnp.float32).astype(jnp.bfloat16)
        b = jnp.asarray(b, jnp.float32).reshape(1, -1)
        flat_args.append(w)
        flat_args.append(b)
        # Full-array blocks with constant block index: weights/biases (~50 KiB total)
        # stay resident in VMEM across all grid steps; only x/out stream.
        in_specs.append(pl.BlockSpec(w.shape, lambda i: (0, 0)))
        in_specs.append(pl.BlockSpec(b.shape, lambda i: (0, 0)))

    out_spec = pl.BlockSpec((tile_b, D_out), lambda i: (i, 0))

    kernel = functools.partial(_snet_kernel, act_fn=act_fn, bf16_act=bf16_act)

    return pl.pallas_call(
        kernel,
        out_shape=jax.ShapeDtypeStruct((N, D_out), jnp.float32),
        grid_spec=pltpu.PrefetchScalarGridSpec(
            num_scalar_prefetch=0,
            grid=grid,
            in_specs=in_specs,
            out_specs=out_spec,
        ),
        compiler_params=pltpu.CompilerParams(
            dimension_semantics=("parallel",),
        ),
    )(x16, *flat_args)


def init_snet_params(key, D_in, H, D_out, std=0.1):
    """Deterministic normal(0, 0.1) init (mirrors S_Net.reset_parameters)."""
    dims = [(D_in, H), (H, 2 * H), (2 * H, 4 * H), (4 * H, 2 * H), (2 * H, H), (H, D_out)]
    params = []
    for (din, dout) in dims:
        key, kw, kb = jax.random.split(key, 3)
        w = std * jax.random.normal(kw, (din, dout), dtype=jnp.float32)
        b = std * jax.random.normal(kb, (1, dout), dtype=jnp.float32)
        params.append((w, b))
    return params


def snet_reference(x, params, act_fn="tanh"):
    act = {"tanh": jnp.tanh,
           "relu": lambda v: jnp.maximum(v, 0.0),
           "sigmoid": jax.nn.sigmoid}[act_fn]
    y = x
    for i, (w, b) in enumerate(params):
        y = y @ w + b
        if i < len(params) - 1:
            y = act(y)
    return y


if __name__ == "__main__":
    # Small shapes consistent with the module: D_in=4, H=32, D_out=2.
    D_in, H, D_out = 4, 32, 2

    key = jax.random.PRNGKey(0)
    key, kx1, kx2 = jax.random.split(key, 3)
    params = init_snet_params(key, D_in, H, D_out)

    # Test 1: tiny batch (single-tile path, no boundary masking needed).
    x_small = jax.random.normal(kx1, (8, D_in), dtype=jnp.float32)
    out_small = jax.block_until_ready(snet_forward(x_small, params, act_fn="tanh"))
    ref_small = snet_reference(x_small, params, act_fn="tanh")
    assert out_small.shape == (8, D_out)
    assert jnp.allclose(out_small, ref_small, atol=2e-2, rtol=2e-2), "mismatch (small batch)"

    # Test 2: ragged batch (multi-step grid + masked boundary block + narrow out store).
    x_big = jax.random.normal(kx2, (520, D_in), dtype=jnp.float32)
    out_big = jax.block_until_ready(snet_forward(x_big, params, act_fn="tanh"))
    ref_big = snet_reference(x_big, params, act_fn="tanh")
    assert out_big.shape == (520, D_out)
    assert jnp.allclose(out_big, ref_big, atol=2e-2, rtol=2e-2), "mismatch (ragged batch)"

    print("KERNEL_OK")
</pallas_src>

<mosaic_0001>
module attributes {stable_mosaic.version = 11 : i64} {
  func.func @_snet_kernel(%arg0: i32, %arg1: memref<8x4xbf16, #tpu.memory_space<vmem>>, %arg2: memref<4x32xbf16, #tpu.memory_space<vmem>>, %arg3: memref<1x32xf32, #tpu.memory_space<vmem>>, %arg4: memref<32x64xbf16, #tpu.memory_space<vmem>>, %arg5: memref<1x64xf32, #tpu.memory_space<vmem>>, %arg6: memref<64x128xbf16, #tpu.memory_space<vmem>>, %arg7: memref<1x128xf32, #tpu.memory_space<vmem>>, %arg8: memref<128x64xbf16, #tpu.memory_space<vmem>>, %arg9: memref<1x64xf32, #tpu.memory_space<vmem>>, %arg10: memref<64x32xbf16, #tpu.memory_space<vmem>>, %arg11: memref<1x32xf32, #tpu.memory_space<vmem>>, %arg12: memref<32x2xbf16, #tpu.memory_space<vmem>>, %arg13: memref<1x2xf32, #tpu.memory_space<vmem>>, %arg14: memref<8x2xf32, #tpu.memory_space<vmem>>) attributes {dimension_semantics = [#tpu.dimension_semantics<parallel>], iteration_bounds = array<i64: 1>, scalar_prefetch = 0 : i64, scratch_operands = 0 : i64, tpu.core_type = #tpu.core_type<tc>, window_params = [{transform_indices = @transform_0, window_bounds = array<i64: 8, 4>}, {pipeline_mode = #tpu.pipeline_mode<synchronous>, transform_indices = @transform_1, window_bounds = array<i64: 4, 32>}, {pipeline_mode = #tpu.pipeline_mode<synchronous>, transform_indices = @transform_2, window_bounds = array<i64: 1, 32>}, {pipeline_mode = #tpu.pipeline_mode<synchronous>, transform_indices = @transform_3, window_bounds = array<i64: 32, 64>}, {pipeline_mode = #tpu.pipeline_mode<synchronous>, transform_indices = @transform_4, window_bounds = array<i64: 1, 64>}, {pipeline_mode = #tpu.pipeline_mode<synchronous>, transform_indices = @transform_5, window_bounds = array<i64: 64, 128>}, {pipeline_mode = #tpu.pipeline_mode<synchronous>, transform_indices = @transform_6, window_bounds = array<i64: 1, 128>}, {pipeline_mode = #tpu.pipeline_mode<synchronous>, transform_indices = @transform_7, window_bounds = array<i64: 128, 64>}, {pipeline_mode = #tpu.pipeline_mode<synchronous>, transform_indices = @transform_8, window_bounds = array<i64: 1, 64>}, {pipeline_mode = #tpu.pipeline_mode<synchronous>, transform_indices = @transform_9, window_bounds = array<i64: 64, 32>}, {pipeline_mode = #tpu.pipeline_mode<synchronous>, transform_indices = @transform_10, window_bounds = array<i64: 1, 32>}, {pipeline_mode = #tpu.pipeline_mode<synchronous>, transform_indices = @transform_11, window_bounds = array<i64: 32, 2>}, {pipeline_mode = #tpu.pipeline_mode<synchronous>, transform_indices = @transform_12, window_bounds = array<i64: 1, 2>}, {transform_indices = @transform_13, window_bounds = array<i64: 8, 2>}]} {
    %c0 = arith.constant 0 : index
    %c0_0 = arith.constant 0 : index
    %0 = vector.load %arg1[%c0, %c0_0] : memref<8x4xbf16, #tpu.memory_space<vmem>>, vector<8x4xbf16>
    %c0_1 = arith.constant 0 : index
    %c0_2 = arith.constant 0 : index
    %1 = vector.load %arg2[%c0_1, %c0_2] : memref<4x32xbf16, #tpu.memory_space<vmem>>, vector<4x32xbf16>
    %cst = arith.constant dense<0.000000e+00> : vector<8x32xf32>
    %2 = tpu.matmul %0, %1, %cst {dimension_numbers = #tpu.dot_dimension_numbers<[1], [0], [0], [1], [0, 0, 1, 1], [], []>} : vector<8x4xbf16>, vector<4x32xbf16>, vector<8x32xf32> -> vector<8x32xf32>
    %c0_3 = arith.constant 0 : index
    %c0_4 = arith.constant 0 : index
    %3 = vector.load %arg3[%c0_3, %c0_4] : memref<1x32xf32, #tpu.memory_space<vmem>>, vector<1x32xf32>
    %4 = vector.broadcast %3 : vector<1x32xf32> to vector<8x32xf32>
    %5 = arith.addf %2, %4 : vector<8x32xf32>
    %6 = math.tanh %5 : vector<8x32xf32>
    %7 = arith.truncf %6 : vector<8x32xf32> to vector<8x32xbf16>
    %c0_5 = arith.constant 0 : index
    %c0_6 = arith.constant 0 : index
    %8 = vector.load %arg4[%c0_5, %c0_6] : memref<32x64xbf16, #tpu.memory_space<vmem>>, vector<32x64xbf16>
    %cst_7 = arith.constant dense<0.000000e+00> : vector<8x64xf32>
    %9 = tpu.matmul %7, %8, %cst_7 {dimension_numbers = #tpu.dot_dimension_numbers<[1], [0], [0], [1], [0, 0, 1, 1], [], []>} : vector<8x32xbf16>, vector<32x64xbf16>, vector<8x64xf32> -> vector<8x64xf32>
    %c0_8 = arith.constant 0 : index
    %c0_9 = arith.constant 0 : index
    %10 = vector.load %arg5[%c0_8, %c0_9] : memref<1x64xf32, #tpu.memory_space<vmem>>, vector<1x64xf32>
    %11 = vector.broadcast %10 : vector<1x64xf32> to vector<8x64xf32>
    %12 = arith.addf %9, %11 : vector<8x64xf32>
    %13 = math.tanh %12 : vector<8x64xf32>
    %14 = arith.truncf %13 : vector<8x64xf32> to vector<8x64xbf16>
    %c0_10 = arith.constant 0 : index
    %c0_11 = arith.constant 0 : index
    %15 = vector.load %arg6[%c0_10, %c0_11] : memref<64x128xbf16, #tpu.memory_space<vmem>>, vector<64x128xbf16>
    %cst_12 = arith.constant dense<0.000000e+00> : vector<8x128xf32>
    %16 = tpu.matmul %14, %15, %cst_12 {dimension_numbers = #tpu.dot_dimension_numbers<[1], [0], [0], [1], [0, 0, 1, 1], [], []>} : vector<8x64xbf16>, vector<64x128xbf16>, vector<8x128xf32> -> vector<8x128xf32>
    %c0_13 = arith.constant 0 : index
    %c0_14 = arith.constant 0 : index
    %17 = vector.load %arg7[%c0_13, %c0_14] : memref<1x128xf32, #tpu.memory_space<vmem>>, vector<1x128xf32>
    %18 = vector.broadcast %17 : vector<1x128xf32> to vector<8x128xf32>
    %19 = arith.addf %16, %18 : vector<8x128xf32>
    %20 = math.tanh %19 : vector<8x128xf32>
    %21 = arith.truncf %20 : vector<8x128xf32> to vector<8x128xbf16>
    %c0_15 = arith.constant 0 : index
    %c0_16 = arith.constant 0 : index
    %22 = vector.load %arg8[%c0_15, %c0_16] : memref<128x64xbf16, #tpu.memory_space<vmem>>, vector<128x64xbf16>
    %cst_17 = arith.constant dense<0.000000e+00> : vector<8x64xf32>
    %23 = tpu.matmul %21, %22, %cst_17 {dimension_numbers = #tpu.dot_dimension_numbers<[1], [0], [0], [1], [0, 0, 1, 1], [], []>} : vector<8x128xbf16>, vector<128x64xbf16>, vector<8x64xf32> -> vector<8x64xf32>
    %c0_18 = arith.constant 0 : index
    %c0_19 = arith.constant 0 : index
    %24 = vector.load %arg9[%c0_18, %c0_19] : memref<1x64xf32, #tpu.memory_space<vmem>>, vector<1x64xf32>
    %25 = vector.broadcast %24 : vector<1x64xf32> to vector<8x64xf32>
    %26 = arith.addf %23, %25 : vector<8x64xf32>
    %27 = math.tanh %26 : vector<8x64xf32>
    %28 = arith.truncf %27 : vector<8x64xf32> to vector<8x64xbf16>
    %c0_20 = arith.constant 0 : index
    %c0_21 = arith.constant 0 : index
    %29 = vector.load %arg10[%c0_20, %c0_21] : memref<64x32xbf16, #tpu.memory_space<vmem>>, vector<64x32xbf16>
    %cst_22 = arith.constant dense<0.000000e+00> : vector<8x32xf32>
    %30 = tpu.matmul %28, %29, %cst_22 {dimension_numbers = #tpu.dot_dimension_numbers<[1], [0], [0], [1], [0, 0, 1, 1], [], []>} : vector<8x64xbf16>, vector<64x32xbf16>, vector<8x32xf32> -> vector<8x32xf32>
    %c0_23 = arith.constant 0 : index
    %c0_24 = arith.constant 0 : index
    %31 = vector.load %arg11[%c0_23, %c0_24] : memref<1x32xf32, #tpu.memory_space<vmem>>, vector<1x32xf32>
    %32 = vector.broadcast %31 : vector<1x32xf32> to vector<8x32xf32>
    %33 = arith.addf %30, %32 : vector<8x32xf32>
    %34 = math.tanh %33 : vector<8x32xf32>
    %35 = arith.truncf %34 : vector<8x32xf32> to vector<8x32xbf16>
    %c0_25 = arith.constant 0 : index
    %c0_26 = arith.constant 0 : index
    %36 = vector.load %arg12[%c0_25, %c0_26] : memref<32x2xbf16, #tpu.memory_space<vmem>>, vector<32x2xbf16>
    %cst_27 = arith.constant dense<0.000000e+00> : vector<8x2xf32>
    %37 = tpu.matmul %35, %36, %cst_27 {dimension_numbers = #tpu.dot_dimension_numbers<[1], [0], [0], [1], [0, 0, 1, 1], [], []>} : vector<8x32xbf16>, vector<32x2xbf16>, vector<8x2xf32> -> vector<8x2xf32>
    %c0_28 = arith.constant 0 : index
    %c0_29 = arith.constant 0 : index
    %38 = vector.load %arg13[%c0_28, %c0_29] : memref<1x2xf32, #tpu.memory_space<vmem>>, vector<1x2xf32>
    %39 = vector.broadcast %38 : vector<1x2xf32> to vector<8x2xf32>
    %40 = arith.addf %37, %39 : vector<8x2xf32>
    %c0_30 = arith.constant 0 : index
    %c0_31 = arith.constant 0 : index
    %41 = vector.load %arg14[%c0_30, %c0_31] : memref<8x2xf32, #tpu.memory_space<vmem>>, vector<8x2xf32>
    tpu.vector_store %arg14[%c0_30, %c0_31], %40 {strides = array<i32>} : memref<8x2xf32, #tpu.memory_space<vmem>>, vector<8x2xf32>,
    return
  }
  func.func @transform_0(%arg0: i32) -> (i32, i32) {
    %c0_i32 = arith.constant 0 : i32
    %c0_i32_0 = arith.constant 0 : i32
    return %arg0, %c0_i32 : i32, i32
  }
  func.func @transform_1(%arg0: i32) -> (i32, i32) {
    %c0_i32 = arith.constant 0 : i32
    %c0_i32_0 = arith.constant 0 : i32
    %c0_i32_1 = arith.constant 0 : i32
    return %c0_i32, %c0_i32_0 : i32, i32
  }
  func.func @transform_2(%arg0: i32) -> (i32, i32) {
    %c0_i32 = arith.constant 0 : i32
    %c0_i32_0 = arith.constant 0 : i32
    %c0_i32_1 = arith.constant 0 : i32
    return %c0_i32, %c0_i32_0 : i32, i32
  }
  func.func @transform_3(%arg0: i32) -> (i32, i32) {
    %c0_i32 = arith.constant 0 : i32
    %c0_i32_0 = arith.constant 0 : i32
    %c0_i32_1 = arith.constant 0 : i32
    return %c0_i32, %c0_i32_0 : i32, i32
  }
  func.func @transform_4(%arg0: i32) -> (i32, i32) {
    %c0_i32 = arith.constant 0 : i32
    %c0_i32_0 = arith.constant 0 : i32
    %c0_i32_1 = arith.constant 0 : i32
    return %c0_i32, %c0_i32_0 : i32, i32
  }
  func.func @transform_5(%arg0: i32) -> (i32, i32) {
    %c0_i32 = arith.constant 0 : i32
    %c0_i32_0 = arith.constant 0 : i32
    %c0_i32_1 = arith.constant 0 : i32
    return %c0_i32, %c0_i32_0 : i32, i32
  }
  func.func @transform_6(%arg0: i32) -> (i32, i32) {
    %c0_i32 = arith.constant 0 : i32
    %c0_i32_0 = arith.constant 0 : i32
    %c0_i32_1 = arith.constant 0 : i32
    return %c0_i32, %c0_i32_0 : i32, i32
  }
  func.func @transform_7(%arg0: i32) -> (i32, i32) {
    %c0_i32 = arith.constant 0 : i32
    %c0_i32_0 = arith.constant 0 : i32
    %c0_i32_1 = arith.constant 0 : i32
    return %c0_i32, %c0_i32_0 : i32, i32
  }
  func.func @transform_8(%arg0: i32) -> (i32, i32) {
    %c0_i32 = arith.constant 0 : i32
    %c0_i32_0 = arith.constant 0 : i32
    %c0_i32_1 = arith.constant 0 : i32
    return %c0_i32, %c0_i32_0 : i32, i32
  }
  func.func @transform_9(%arg0: i32) -> (i32, i32) {
    %c0_i32 = arith.constant 0 : i32
    %c0_i32_0 = arith.constant 0 : i32
    %c0_i32_1 = arith.constant 0 : i32
    return %c0_i32, %c0_i32_0 : i32, i32
  }
  func.func @transform_10(%arg0: i32) -> (i32, i32) {
    %c0_i32 = arith.constant 0 : i32
    %c0_i32_0 = arith.constant 0 : i32
    %c0_i32_1 = arith.constant 0 : i32
    return %c0_i32, %c0_i32_0 : i32, i32
  }
  func.func @transform_11(%arg0: i32) -> (i32, i32) {
    %c0_i32 = arith.constant 0 : i32
    %c0_i32_0 = arith.constant 0 : i32
    %c0_i32_1 = arith.constant 0 : i32
    return %c0_i32, %c0_i32_0 : i32, i32
  }
  func.func @transform_12(%arg0: i32) -> (i32, i32) {
    %c0_i32 = arith.constant 0 : i32
    %c0_i32_0 = arith.constant 0 : i32
    %c0_i32_1 = arith.constant 0 : i32
    return %c0_i32, %c0_i32_0 : i32, i32
  }
  func.func @transform_13(%arg0: i32) -> (i32, i32) {
    %c0_i32 = arith.constant 0 : i32
    %c0_i32_0 = arith.constant 0 : i32
    return %arg0, %c0_i32 : i32, i32
  }
}

</mosaic_0001>

<bundles_post_ra>
// kernel: tpu_custom_call.1
= control target key start
LH: loop header
LB: loop body
LE: loop exit
PB: predicated region body
PF: predicated region fallthrough
CT: control target
= control target key end

     0   :  { %vm55_vm0 = vcmask 1041408   ;;  %vm51_vm1 = vcmask 31744   ;;  %vm94_vm2 = vcmask 261120   ;;  %vm149_vm3 = vcmask 523264   ;;  %s629_s1 = inlined_call_operand.vmem [shape: bf16[4,32], index: 1, kind: input, shape index: {}]   ;;  %s630_s0 = inlined_call_operand.vmem [shape: bf16[8,4], index: 0, kind: input, shape index: {}]   ;;  %s631_s2 = inlined_call_operand.vmem [shape: f32[1,32], index: 2, kind: input, shape index: {}]   ;;  %s632_s4 = inlined_call_operand.vmem [shape: f32[1,64], index: 4, kind: input, shape index: {}]   ;;  %s633_s3 = inlined_call_operand.vmem [shape: bf16[32,64], index: 3, kind: input, shape index: {}]   ;;  %s634_s5 = inlined_call_operand.vmem [shape: bf16[64,128], index: 5, kind: input, shape index: {}]   ;;  %s635_s6 = inlined_call_operand.vmem [shape: f32[1,128], index: 6, kind: input, shape index: {}]   ;;  %s636_s7 = inlined_call_operand.vmem [shape: bf16[128,64], index: 7, kind: input, shape index: {}]   ;;  %s637_s8 = inlined_call_operand.vmem [shape: f32[1,64], index: 8, kind: input, shape index: {}]   ;;  %s638_s9 = inlined_call_operand.vmem [shape: bf16[64,32], index: 9, kind: input, shape index: {}]   ;;  %s639_s10 = inlined_call_operand.vmem [shape: f32[1,32], index: 10, kind: input, shape index: {}]   ;;  %s640_s11 = inlined_call_operand.vmem [shape: bf16[32,2], index: 11, kind: input, shape index: {}]   ;;  %s641_s12 = inlined_call_operand.vmem [shape: f32[1,2], index: 12, kind: input, shape index: {}]   ;;  %s642_s13 = inlined_call_operand.vmem [shape: f32[8,2], index: 13, kind: output, shape index: {}]  }
   0x1   :  { %v46_v0 = vld [vmem:[%s629_s1] sm:$0x3]  ;;  %v433_v3 = vld [vmem:[%s633_s3 + $0x8] sm:$0xff]  ;;  %v437_v5 = vld [vmem:[%s634_s5 + $0x18] sm:$0xff]  ;;  %vm341_vm4 = vcmask 15360  }
   0x2   :  { %v57_v1 = vsel %vm55_vm0, %v46_v0, 0  ;;  %v45_v2 = vld [vmem:[%s630_s0] sm:$0xf]  ;;  %104 = vmatpush.bf16.msra.mxu1 %v433_v3  ;;  %157 = vmatpush.bf16.msra.mxu2 %v437_v5  ;;  %v436_v12 = vld [vmem:[%s634_s5 + $0x10] sm:$0xff]  ;;  %v435_v13 = vld [vmem:[%s634_s5 + $0x8] sm:$0xff] }
   0x3   :  { %66 = vmatpush.bf16.msra.mxu0 %v57_v1  ;;  %v432_v4 = vld [vmem:[%s633_s3] sm:$0xff]  ;;  %v445_v15 = vld [vmem:[%s636_s7 + $0x38] sm:$0xff]  ;;  %v444_v16 = vld [vmem:[%s636_s7 + $0x30] sm:$0xff] }
   0x4   :  { %v452_v6 = vld [vmem:[%s631_s2] ss:$0 sm:$0xff]  ;;  %236 = vmatpush.bf16.msra.mxu3 %v445_v15  ;;  %v443_v17 = vld [vmem:[%s636_s7 + $0x28] sm:$0xff]  ;;  %v441_v19 = vld [vmem:[%s636_s7 + $0x18] sm:$0xff] }
   0x5   :  { %v434_v14 = vld [vmem:[%s634_s5] sm:$0xff]  ;;  %v440_v26 = vld [vmem:[%s636_s7 + $0x10] sm:$0xff]  ;;  %v439_v27 = vld [vmem:[%s636_s7 + $0x8] sm:$0xff] }
   0x6   :  { %347 = vmatmul.msk.bf16.vlgmr.msra.gmra.mxu0 %vm51_vm1, %v45_v2  ;;  %105 = vmatpush.bf16.msra.mxu1 %v432_v4  ;;  %v442_v18 = vld [vmem:[%s636_s7 + $0x20] sm:$0xff]  ;;  %v449_v29 = vld [vmem:[%s638_s9 + $0x18] sm:$0xff]  ;;  %v448_v36 = vld [vmem:[%s638_s9 + $0x10] sm:$0xff] }
   0x7   :  { %158 = vmatpush.bf16.msra.mxu2 %v436_v12  ;;  %v453_v20 = vld [vmem:[%s632_s4] ss:$0 sm:$0xff]  ;;  %294 = vmatpush.bf16.msrb.mxu0 %v449_v29  ;;  %v447_v37 = vld [vmem:[%s638_s9 + $0x8] sm:$0xff] }
   0x8   :  { %237 = vmatpush.bf16.msra.mxu3 %v444_v16  ;;  %v438_v28 = vld [vmem:[%s636_s7] sm:$0xff]  ;;  %v451_v39 = vld [vmem:[%s640_s11 + $0x8] sm:$0xff] }
   0x9   :  { %v454_v30 = vld [vmem:[%s635_s6] ss:$0 sm:$0xff] }
   0xa   :  { %v446_v38 = vld [vmem:[%s638_s9] sm:$0xff]  ;;  %334 = vmatpush.bf16.msrb.mxu1 %v451_v39 }
   0xb   :  { %159 = vmatpush.bf16.msra.mxu2 %v435_v13  ;;  %295 = vmatpush.bf16.msrb.mxu0 %v448_v36  ;;  %v455_v40 = vld [vmem:[%s637_s8] ss:$0 sm:$0xff] }
   0xc   :  { %238 = vmatpush.bf16.msra.mxu3 %v443_v17  ;;  %v450_v46 = vld [vmem:[%s640_s11] sm:$0xff] }
   0xd   :  { %v456_v47 = vld [vmem:[%s639_s10] ss:$0 sm:$0xff] }
   0xe   :  { %335 = vmatpush.bf16.msrb.mxu1 %v450_v46  ;;  %v457_v53 = vld [vmem:[%s641_s12] ss:$0 sm:$0xff] }
   0xf   :  { %160 = vmatpush.bf16.msra.mxu2 %v434_v14  ;;  %296 = vmatpush.bf16.msrb.mxu0 %v447_v37 }
  0x10   :  { %239 = vmatpush.bf16.msra.mxu3 %v442_v18 }
  0x13   :  { %297 = vmatpush.bf16.msrb.mxu0 %v446_v38 }
  0x14   :  { %240 = vmatpush.bf16.msra.mxu3 %v441_v19 }
  0x18   :  { %241 = vmatpush.bf16.msra.mxu3 %v440_v26 }
  0x1c   :  { %242 = vmatpush.bf16.msra.mxu3 %v439_v27 }
  0x20   :  { %243 = vmatpush.bf16.msra.mxu3 %v438_v28 }
  0x83   :  { %v68_v7 = vpop.f32.mrf.mxu0 }
  0x84   :  { %v69_v8 = vadd.f32 %v452_v6, %v68_v7 }
  0x86   :  { %458 = vtanh.f32 %v69_v8 }
  0x8b   :  { %v70_v9 = vpop.f32.mrf.mxu0 }
  0x8c   :  { %v459_v10 = vpop.eup %458 }
  0x8d   :  { %v73_v11 = vpack.c.bf16 %v459_v10, %v459_v10 }
  0x8f   :  { %356 = vmatmul.msk.bf16.vlgmr.msra.gmra.mxu1 %vm94_vm2, %v73_v11 }
 0x10c   :  { %v107_v21 = vpop.f32.mrf.mxu1 }
 0x10d   :  { %v108_v22 = vadd.f32 %v453_v20, %v107_v21 }
 0x10f   :  { %460 = vtanh.f32 %v108_v22 }
 0x114   :  { %v109_v23 = vpop.f32.mrf.mxu1 }
 0x115   :  { %v461_v24 = vpop.eup %460 }
 0x116   :  { %v112_v25 = vpack.c.bf16 %v461_v24, %v461_v24 }
 0x118   :  { %373 = vmatmul.msk.bf16.vlgmr.msra.gmra.mxu2 %vm149_vm3, %v112_v25 }
 0x19b   :  { %v162_v31 = vpop.f32.mrf.mxu2 }
 0x19c   :  { %v163_v32 = vadd.f32 %v454_v30, %v162_v31 }
 0x19e   :  { %462 = vtanh.f32 %v163_v32 }
 0x1a3   :  { %v164_v33 = vpop.f32.mrf.mxu2 }
 0x1a4   :  { %v463_v34 = vpop.eup %462 }
 0x1a5   :  { %v167_v35 = vpack.c.bf16 %v463_v34, %v463_v34 }
 0x1a7   :  { %244 = vmatmul.bf16.vlgmr.msra.gmra.mxu3 %v167_v35 }
 0x22a   :  { %v245_v41 = vpop.f32.mrf.mxu3 }
 0x22b   :  { %v246_v42 = vadd.f32 %v455_v40, %v245_v41 }
 0x22d   :  { %464 = vtanh.f32 %v246_v42 }
 0x232   :  { %v247_v43 = vpop.f32.mrf.mxu3 }
 0x233   :  { %v465_v44 = vpop.eup %464 }
 0x234   :  { %v250_v45 = vpack.c.bf16 %v465_v44, %v465_v44 }
 0x236   :  { %422 = vmatmul.msk.bf16.vlgmr.msrb.gmra.mxu0 %vm149_vm3, %v250_v45 }
 0x2b3   :  { %v299_v48 = vpop.f32.mrf.mxu0 }
 0x2b4   :  { %v300_v49 = vadd.f32 %v456_v47, %v299_v48 }
 0x2b6   :  { %466 = vtanh.f32 %v300_v49 }
 0x2bb   :  { %v301_v50 = vpop.f32.mrf.mxu0 }
 0x2bc   :  { %v467_v51 = vpop.eup %466 }
 0x2bd   :  { %v304_v52 = vpack.c.bf16 %v467_v51, %v467_v51 }
 0x2bf   :  { %431 = vmatmul.msk.bf16.vlgmr.msrb.gmra.mxu1 %vm94_vm2, %v304_v52 }
 0x33c   :  { %v337_v54 = vpop.f32.mrf.mxu1 }
 0x33d   :  { %v338_v55 = vadd.f32 %v457_v53, %v337_v54 }
 0x33f   :  { %342 = vst.msk [vmem:[%s642_s13] sm:$0xff] %vm341_vm4, %v338_v55 }
 0x344   :  { %v339_v56 = vpop.f32.mrf.mxu1 }

</bundles_post_ra>
